<compile_context>
chip_gen: v5e
topology: v5e:2x2
jax: 0.10.0
libtpu: 0.0.40
codegen_flags: <defaults>
</compile_context>

<pallas_src>
import functools

import jax
import jax.numpy as jnp
from jax.experimental import pallas as pl
from jax.experimental.pallas import tpu as pltpu


def _round_up(x, m):
    return (x + m - 1) // m * m


def _temporal_block_kernel(*refs, K, d, pad, Lt, downsample):
    if downsample:
        (x_ref, w1_ref, b1_ref, w2_ref, b2_ref, wd_ref, bd_ref, out_ref) = refs
    else:
        (x_ref, w1_ref, b1_ref, w2_ref, b2_ref, out_ref) = refs
        wd_ref = bd_ref = None

    # x_ref:  (1, C_in, Lpad + 2*pad)  bf16, resident across the time-tile axis
    # w1_ref: (C_out, K*C_in)  bf16, tap-stacked
    # w2_ref: (C_out, K*C_out) bf16, tap-stacked
    # wd_ref: (C_out, C_in)    bf16 (only if downsample)
    # b*_ref: (C_out, 1)       f32
    # out_ref:(1, C_out, Lt)   f32
    j = pl.program_id(1)
    Lh = Lt + pad                                   # h1 window = tile + conv2 halo

    # One lane-aligned dynamic load of the halo'd input window for this tile.
    base = pl.multiple_of(j * Lt, 128)              # Lt is a multiple of 128
    x_win = x_ref[0, :, pl.ds(base, Lt + 2 * pad)]  # (C_in, Lt + 2*pad) bf16

    # ---- conv1: single matmul, taps stacked on the contraction axis ----
    xim = jnp.concatenate([x_win[:, t * d:t * d + Lh] for t in range(K)],
                          axis=0)                   # (K*C_in, Lh)
    h1 = jnp.dot(w1_ref[...], xim, preferred_element_type=jnp.float32)
    h1 = jnp.maximum(h1 + b1_ref[...], 0.0)         # bias + relu1 (f32 VPU)
    # dropout1 is identity in eval mode.

    # Columns of h1 at real time < 0 must be ZERO (PyTorch zero-pads conv2's
    # input), not relu(b1) — mask the left halo of tile 0 with an iota compare.
    col = (j * Lt - pad) + jax.lax.broadcasted_iota(jnp.int32, (1, Lh), 1)
    h1 = jnp.where(col >= 0, h1, 0.0).astype(jnp.bfloat16)

    # ---- conv2: single matmul over the tap-stacked h1 window ----
    him = jnp.concatenate([h1[:, t * d:t * d + Lt] for t in range(K)],
                          axis=0)                   # (K*C_out, Lt)
    h2 = jnp.dot(w2_ref[...], him, preferred_element_type=jnp.float32)
    h2 = jnp.maximum(h2 + b2_ref[...], 0.0)         # bias + relu2 (f32 VPU)
    # dropout2 is identity in eval mode.

    # ---- residual branch (1x1 conv iff C_in != C_out, else identity) ----
    x_tile = x_win[:, 2 * pad:2 * pad + Lt]         # (C_in, Lt)
    if downsample:
        res = jnp.dot(wd_ref[...], x_tile,
                      preferred_element_type=jnp.float32) + bd_ref[...]
    else:
        res = x_tile.astype(jnp.float32)

    out_ref[0] = jnp.maximum(h2 + res, 0.0)         # final relu


def temporal_block(x, params, *, kernel_size, dilation, padding, time_tile=512):
    """x: (B, C_in, L) float32.  Returns (B, C_out, L) float32."""
    B, C_in, L = x.shape
    K, d, pad = kernel_size, dilation, padding
    w1 = params["w1"]                               # (C_out, C_in, K) effective weights
    C_out = w1.shape[0]
    downsample = params.get("wd") is not None       # mirrors PyTorch: C_in != C_out

    # Lane-dense time tiling: Lt multiple of 128; pad L on the right (zeros are
    # harmless for a causal conv) and slice the output back afterwards.
    Lt = _round_up(min(time_tile, _round_up(L, 128)), 128)
    Lpad = _round_up(L, Lt)
    n_t = Lpad // Lt

    # Left pad by 2*pad (conv1 + conv2 halos recomputed per tile), cast to bf16
    # so the activation DMA is half-width (matters most on v7x's 64 MiB VMEM).
    x_pad = jnp.pad(x, ((0, 0), (0, 0), (2 * pad, Lpad - L))).astype(jnp.bfloat16)
    Ltot = Lpad + 2 * pad

    # Tap-stacked, bf16 weights: w_s[o, t*C + c] = w[o, c, t]
    w1s = jnp.transpose(w1, (0, 2, 1)).reshape(C_out, K * C_in).astype(jnp.bfloat16)
    w2s = jnp.transpose(params["w2"], (0, 2, 1)).reshape(C_out, K * C_out).astype(jnp.bfloat16)
    b1 = params["b1"].reshape(C_out, 1).astype(jnp.float32)
    b2 = params["b2"].reshape(C_out, 1).astype(jnp.float32)

    kernel = functools.partial(_temporal_block_kernel,
                               K=K, d=d, pad=pad, Lt=Lt, downsample=downsample)

    def const_spec(shape):
        return pl.BlockSpec(shape, lambda b, j: (0,) * len(shape))

    in_specs = [
        # Full padded row of one batch element; constant across the j axis so it
        # stays VMEM-resident while its time tiles are processed.
        pl.BlockSpec((1, C_in, Ltot), lambda b, j: (b, 0, 0)),
        const_spec(w1s.shape), const_spec(b1.shape),
        const_spec(w2s.shape), const_spec(b2.shape),
    ]
    args = [x_pad, w1s, b1, w2s, b2]
    if downsample:
        wd = params["wd"].reshape(C_out, C_in).astype(jnp.bfloat16)
        bd = params["bd"].reshape(C_out, 1).astype(jnp.float32)
        in_specs += [const_spec(wd.shape), const_spec(bd.shape)]
        args += [wd, bd]

    out = pl.pallas_call(
        kernel,
        out_shape=jax.ShapeDtypeStruct((B, C_out, Lpad), jnp.float32),
        grid=(B, n_t),
        in_specs=in_specs,
        out_specs=pl.BlockSpec((1, C_out, Lt), lambda b, j: (b, 0, j)),
        compiler_params=pltpu.CompilerParams(
            dimension_semantics=("parallel", "parallel")),
    )(*args)
    return out[:, :, :L]


# -------------------- parameter construction (deterministic) --------------------

def weight_norm_effective(v, g):
    """PyTorch weight_norm: w = g * v / ||v||, norm over all dims except 0."""
    norm = jnp.sqrt(jnp.sum(v * v, axis=(1, 2), keepdims=True))
    return g[:, None, None] * v / norm


def make_params(key, C_in, C_out, K):
    ks = jax.random.split(key, 6)
    # conv weights ~ N(0, 0.01) per init_weights(); weight_norm g initialized to ||v||.
    v1 = 0.01 * jax.random.normal(ks[0], (C_out, C_in, K), jnp.float32)
    w1 = weight_norm_effective(v1, jnp.sqrt(jnp.sum(v1 * v1, axis=(1, 2))))
    v2 = 0.01 * jax.random.normal(ks[1], (C_out, C_out, K), jnp.float32)
    w2 = weight_norm_effective(v2, jnp.sqrt(jnp.sum(v2 * v2, axis=(1, 2))))
    # Conv1d default bias init: U(-1/sqrt(fan_in), 1/sqrt(fan_in)); not reset by init_weights.
    b1 = jax.random.uniform(ks[3], (C_out,), jnp.float32,
                            -1.0 / jnp.sqrt(C_in * K), 1.0 / jnp.sqrt(C_in * K))
    b2 = jax.random.uniform(ks[4], (C_out,), jnp.float32,
                            -1.0 / jnp.sqrt(C_out * K), 1.0 / jnp.sqrt(C_out * K))
    p = {"w1": w1, "b1": b1, "w2": w2, "b2": b2, "wd": None, "bd": None}
    if C_in != C_out:   # downsample exists only when n_inputs != n_outputs
        p["wd"] = 0.01 * jax.random.normal(ks[2], (C_out, C_in), jnp.float32)
        p["bd"] = jax.random.uniform(ks[5], (C_out,), jnp.float32,
                                     -1.0 / jnp.sqrt(C_in), 1.0 / jnp.sqrt(C_in))
    return p


# -------------------- pure-JAX reference (for correctness check) --------------------

def ref_forward(x, p, *, kernel_size, dilation, padding, quantize=False):
    """quantize=True mimics the kernel's bf16 MXU operands (fp32 accumulation)."""
    q = (lambda a: a.astype(jnp.bfloat16).astype(jnp.float32)) if quantize else (lambda a: a)

    def causal_conv(inp, w_oik, b):
        out = jax.lax.conv_general_dilated(
            q(inp), q(w_oik), window_strides=(1,), padding=[(padding, padding)],
            rhs_dilation=(dilation,), dimension_numbers=("NCH", "OIH", "NCH"),
            precision=jax.lax.Precision.HIGHEST)
        out = out + b[None, :, None]
        return out[:, :, :out.shape[2] - padding]          # Chomp1d

    h = jnp.maximum(causal_conv(x, p["w1"], p["b1"]), 0.0)
    h = jnp.maximum(causal_conv(h, p["w2"], p["b2"]), 0.0)
    if p.get("wd") is not None:
        res = jnp.einsum("oc,bcl->bol", q(p["wd"]), q(x),
                         precision=jax.lax.Precision.HIGHEST) + p["bd"][None, :, None]
    else:
        res = x
    return jnp.maximum(h + res, 0.0)


if __name__ == "__main__":
    # Small shapes consistent with Conv1d NCL inputs; L=256 exercises 2 time tiles.
    B, C_in, C_out, L = 2, 4, 8, 256
    kernel_size, stride, dilation = 3, 1, 1
    padding = (kernel_size - 1) * dilation                 # standard TCN causal padding

    key = jax.random.PRNGKey(0)
    kx, kp = jax.random.split(key)
    x = jax.random.normal(kx, (B, C_in, L), jnp.float32)
    params = make_params(kp, C_in, C_out, kernel_size)

    out = temporal_block(x, params, kernel_size=kernel_size,
                         dilation=dilation, padding=padding, time_tile=128)
    out = jax.block_until_ready(out)
    assert out.shape == (B, C_out, L)

    # Tight structural check vs. a reference using the same bf16 operands / f32 accum.
    ref_q = ref_forward(x, params, kernel_size=kernel_size, dilation=dilation,
                        padding=padding, quantize=True)
    assert jnp.allclose(out, ref_q, atol=1e-4, rtol=1e-4), "mismatch vs bf16-operand reference"
    # Looser sanity check vs. the pure fp32 module semantics.
    ref_f = ref_forward(x, params, kernel_size=kernel_size, dilation=dilation,
                        padding=padding, quantize=False)
    assert jnp.allclose(out, ref_f, atol=2e-2, rtol=2e-2), "mismatch vs fp32 reference"

    print("KERNEL_OK")
</pallas_src>

<mosaic_0001>
module attributes {stable_mosaic.version = 11 : i64} {
  func.func @_temporal_block_kernel(%arg0: i32, %arg1: i32, %arg2: memref<1x4x260xbf16, #tpu.memory_space<vmem>>, %arg3: memref<8x12xbf16, #tpu.memory_space<vmem>>, %arg4: memref<8x1xf32, #tpu.memory_space<vmem>>, %arg5: memref<8x24xbf16, #tpu.memory_space<vmem>>, %arg6: memref<8x1xf32, #tpu.memory_space<vmem>>, %arg7: memref<8x4xbf16, #tpu.memory_space<vmem>>, %arg8: memref<8x1xf32, #tpu.memory_space<vmem>>, %arg9: memref<1x8x128xf32, #tpu.memory_space<vmem>>) attributes {dimension_semantics = [#tpu.dimension_semantics<parallel>, #tpu.dimension_semantics<parallel>], iteration_bounds = array<i64: 2, 2>, scalar_prefetch = 0 : i64, scratch_operands = 0 : i64, tpu.core_type = #tpu.core_type<tc>, window_params = [{transform_indices = @transform_0, window_bounds = array<i64: 1, 4, 260>}, {pipeline_mode = #tpu.pipeline_mode<synchronous>, transform_indices = @transform_1, window_bounds = array<i64: 8, 12>}, {pipeline_mode = #tpu.pipeline_mode<synchronous>, transform_indices = @transform_2, window_bounds = array<i64: 8, 1>}, {pipeline_mode = #tpu.pipeline_mode<synchronous>, transform_indices = @transform_3, window_bounds = array<i64: 8, 24>}, {pipeline_mode = #tpu.pipeline_mode<synchronous>, transform_indices = @transform_4, window_bounds = array<i64: 8, 1>}, {pipeline_mode = #tpu.pipeline_mode<synchronous>, transform_indices = @transform_5, window_bounds = array<i64: 8, 4>}, {pipeline_mode = #tpu.pipeline_mode<synchronous>, transform_indices = @transform_6, window_bounds = array<i64: 8, 1>}, {transform_indices = @transform_7, window_bounds = array<i64: 1, 8, 128>}]} {
    %c128_i32 = arith.constant 128 : i32
    %0 = arith.muli %arg1, %c128_i32 : i32
    %1 = tpu.assume_multiple %0, 128 : i32
    %c0 = arith.constant 0 : index
    %c0_0 = arith.constant 0 : index
    %2 = arith.index_cast %1 : i32 to index
    %3 = vector.load %arg2[%c0, %c0_0, %2] : memref<1x4x260xbf16, #tpu.memory_space<vmem>>, vector<1x4x132xbf16>
    %4 = vector.shape_cast %3 : vector<1x4x132xbf16> to vector<4x132xbf16>
    %5 = vector.extract_strided_slice %4 {offsets = [0, 0], sizes = [4, 130], strides = [1, 1]} : vector<4x132xbf16> to vector<4x130xbf16>
    %6 = vector.extract_strided_slice %4 {offsets = [0, 1], sizes = [4, 130], strides = [1, 1]} : vector<4x132xbf16> to vector<4x130xbf16>
    %7 = vector.extract_strided_slice %4 {offsets = [0, 2], sizes = [4, 130], strides = [1, 1]} : vector<4x132xbf16> to vector<4x130xbf16>
    %8 = tpu.concatenate %5, %6, %7 in 0 : vector<4x130xbf16>, vector<4x130xbf16>, vector<4x130xbf16> -> vector<12x130xbf16>
    %c0_1 = arith.constant 0 : index
    %c0_2 = arith.constant 0 : index
    %9 = vector.load %arg3[%c0_1, %c0_2] : memref<8x12xbf16, #tpu.memory_space<vmem>>, vector<8x12xbf16>
    %cst = arith.constant dense<0.000000e+00> : vector<8x130xf32>
    %10 = tpu.matmul %9, %8, %cst {dimension_numbers = #tpu.dot_dimension_numbers<[1], [0], [0], [1], [0, 0, 1, 1], [], []>} : vector<8x12xbf16>, vector<12x130xbf16>, vector<8x130xf32> -> vector<8x130xf32>
    %c0_3 = arith.constant 0 : index
    %c0_4 = arith.constant 0 : index
    %11 = vector.load %arg4[%c0_3, %c0_4] : memref<8x1xf32, #tpu.memory_space<vmem>>, vector<8x1xf32>
    %12 = vector.broadcast %11 : vector<8x1xf32> to vector<8x130xf32>
    %13 = arith.addf %10, %12 : vector<8x130xf32>
    %cst_5 = arith.constant 0.000000e+00 : f32
    %14 = vector.broadcast %cst_5 : f32 to vector<8x130xf32>
    %15 = arith.maximumf %13, %14 : vector<8x130xf32>
    %c128_i32_6 = arith.constant 128 : i32
    %16 = arith.muli %arg1, %c128_i32_6 : i32
    %c2_i32 = arith.constant 2 : i32
    %17 = arith.subi %16, %c2_i32 : i32
    %18 = tpu.iota {dimensions = array<i32: 1>} : vector<1x130xi32>
    %19 = vector.broadcast %17 : i32 to vector<1x130xi32>
    %20 = arith.addi %19, %18 : vector<1x130xi32>
    %c0_i32 = arith.constant 0 : i32
    %21 = vector.broadcast %c0_i32 : i32 to vector<1x130xi32>
    %22 = arith.cmpi sge, %20, %21 : vector<1x130xi32>
    %cst_7 = arith.constant 0.000000e+00 : f32
    %23 = vector.shape_cast %22 : vector<1x130xi1> to vector<1x130xi1>
    %24 = vector.broadcast %23 : vector<1x130xi1> to vector<8x130xi1>
    %25 = vector.broadcast %cst_7 : f32 to vector<8x130xf32>
    %26 = arith.select %24, %15, %25 : vector<8x130xi1>, vector<8x130xf32>
    %27 = arith.truncf %26 : vector<8x130xf32> to vector<8x130xbf16>
    %28 = vector.extract_strided_slice %27 {offsets = [0, 0], sizes = [8, 128], strides = [1, 1]} : vector<8x130xbf16> to vector<8x128xbf16>
    %29 = vector.extract_strided_slice %27 {offsets = [0, 1], sizes = [8, 128], strides = [1, 1]} : vector<8x130xbf16> to vector<8x128xbf16>
    %30 = vector.extract_strided_slice %27 {offsets = [0, 2], sizes = [8, 128], strides = [1, 1]} : vector<8x130xbf16> to vector<8x128xbf16>
    %31 = tpu.concatenate %28, %29, %30 in 0 : vector<8x128xbf16>, vector<8x128xbf16>, vector<8x128xbf16> -> vector<24x128xbf16>
    %c0_8 = arith.constant 0 : index
    %c0_9 = arith.constant 0 : index
    %32 = vector.load %arg5[%c0_8, %c0_9] : memref<8x24xbf16, #tpu.memory_space<vmem>>, vector<8x24xbf16>
    %cst_10 = arith.constant dense<0.000000e+00> : vector<8x128xf32>
    %33 = tpu.matmul %32, %31, %cst_10 {dimension_numbers = #tpu.dot_dimension_numbers<[1], [0], [0], [1], [0, 0, 1, 1], [], []>} : vector<8x24xbf16>, vector<24x128xbf16>, vector<8x128xf32> -> vector<8x128xf32>
    %c0_11 = arith.constant 0 : index
    %c0_12 = arith.constant 0 : index
    %34 = vector.load %arg6[%c0_11, %c0_12] : memref<8x1xf32, #tpu.memory_space<vmem>>, vector<8x1xf32>
    %35 = vector.broadcast %34 : vector<8x1xf32> to vector<8x128xf32>
    %36 = arith.addf %33, %35 : vector<8x128xf32>
    %cst_13 = arith.constant 0.000000e+00 : f32
    %37 = vector.broadcast %cst_13 : f32 to vector<8x128xf32>
    %38 = arith.maximumf %36, %37 : vector<8x128xf32>
    %39 = vector.extract_strided_slice %4 {offsets = [0, 4], sizes = [4, 128], strides = [1, 1]} : vector<4x132xbf16> to vector<4x128xbf16>
    %c0_14 = arith.constant 0 : index
    %c0_15 = arith.constant 0 : index
    %40 = vector.load %arg7[%c0_14, %c0_15] : memref<8x4xbf16, #tpu.memory_space<vmem>>, vector<8x4xbf16>
    %cst_16 = arith.constant dense<0.000000e+00> : vector<8x128xf32>
    %41 = tpu.matmul %40, %39, %cst_16 {dimension_numbers = #tpu.dot_dimension_numbers<[1], [0], [0], [1], [0, 0, 1, 1], [], []>} : vector<8x4xbf16>, vector<4x128xbf16>, vector<8x128xf32> -> vector<8x128xf32>
    %c0_17 = arith.constant 0 : index
    %c0_18 = arith.constant 0 : index
    %42 = vector.load %arg8[%c0_17, %c0_18] : memref<8x1xf32, #tpu.memory_space<vmem>>, vector<8x1xf32>
    %43 = vector.broadcast %42 : vector<8x1xf32> to vector<8x128xf32>
    %44 = arith.addf %41, %43 : vector<8x128xf32>
    %45 = arith.addf %38, %44 : vector<8x128xf32>
    %cst_19 = arith.constant 0.000000e+00 : f32
    %46 = vector.broadcast %cst_19 : f32 to vector<8x128xf32>
    %47 = arith.maximumf %45, %46 : vector<8x128xf32>
    %c0_20 = arith.constant 0 : index
    %c0_21 = arith.constant 0 : index
    %c0_22 = arith.constant 0 : index
    %48 = vector.load %arg9[%c0_20, %c0_21, %c0_22] : memref<1x8x128xf32, #tpu.memory_space<vmem>>, vector<1x8x128xf32>
    %49 = vector.shape_cast %48 : vector<1x8x128xf32> to vector<8x128xf32>
    %50 = vector.shape_cast %47 : vector<8x128xf32> to vector<1x8x128xf32>
    tpu.vector_store %arg9[%c0_20, %c0_21, %c0_22], %50 {strides = array<i32>} : memref<1x8x128xf32, #tpu.memory_space<vmem>>, vector<1x8x128xf32>,
    return
  }
  func.func @transform_0(%arg0: i32, %arg1: i32) -> (i32, i32, i32) {
    %c0_i32 = arith.constant 0 : i32
    %c0_i32_0 = arith.constant 0 : i32
    %c0_i32_1 = arith.constant 0 : i32
    return %arg0, %c0_i32, %c0_i32_0 : i32, i32, i32
  }
  func.func @transform_1(%arg0: i32, %arg1: i32) -> (i32, i32) {
    %c0_i32 = arith.constant 0 : i32
    %c0_i32_0 = arith.constant 0 : i32
    %c0_i32_1 = arith.constant 0 : i32
    return %c0_i32, %c0_i32_0 : i32, i32
  }
  func.func @transform_2(%arg0: i32, %arg1: i32) -> (i32, i32) {
    %c0_i32 = arith.constant 0 : i32
    %c0_i32_0 = arith.constant 0 : i32
    %c0_i32_1 = arith.constant 0 : i32
    return %c0_i32, %c0_i32_0 : i32, i32
  }
  func.func @transform_3(%arg0: i32, %arg1: i32) -> (i32, i32) {
    %c0_i32 = arith.constant 0 : i32
    %c0_i32_0 = arith.constant 0 : i32
    %c0_i32_1 = arith.constant 0 : i32
    return %c0_i32, %c0_i32_0 : i32, i32
  }
  func.func @transform_4(%arg0: i32, %arg1: i32) -> (i32, i32) {
    %c0_i32 = arith.constant 0 : i32
    %c0_i32_0 = arith.constant 0 : i32
    %c0_i32_1 = arith.constant 0 : i32
    return %c0_i32, %c0_i32_0 : i32, i32
  }
  func.func @transform_5(%arg0: i32, %arg1: i32) -> (i32, i32) {
    %c0_i32 = arith.constant 0 : i32
    %c0_i32_0 = arith.constant 0 : i32
    %c0_i32_1 = arith.constant 0 : i32
    return %c0_i32, %c0_i32_0 : i32, i32
  }
  func.func @transform_6(%arg0: i32, %arg1: i32) -> (i32, i32) {
    %c0_i32 = arith.constant 0 : i32
    %c0_i32_0 = arith.constant 0 : i32
    %c0_i32_1 = arith.constant 0 : i32
    return %c0_i32, %c0_i32_0 : i32, i32
  }
  func.func @transform_7(%arg0: i32, %arg1: i32) -> (i32, i32, i32) {
    %c0_i32 = arith.constant 0 : i32
    %c0_i32_0 = arith.constant 0 : i32
    return %arg0, %c0_i32, %arg1 : i32, i32, i32
  }
}

</mosaic_0001>

<bundles_post_ra>
// kernel: tpu_custom_call.1
= control target key start
LH: loop header
LB: loop body
LE: loop exit
PB: predicated region body
PF: predicated region fallthrough
CT: control target
= control target key end

     0   :  { %12 = vsyncpa [#allocation3], 0  ;;  %s975_s0 = inlined_call_operand.vmem [shape: bf16[2,4,260], index: 0, kind: input, shape index: {}]   ;;  %s976_s1 = inlined_call_operand.vmem [shape: bf16[8,12], index: 1, kind: input, shape index: {}]   ;;  %s977_s2 = inlined_call_operand.vmem [shape: f32[8,1], index: 2, kind: input, shape index: {}]   ;;  %s978_s3 = inlined_call_operand.vmem [shape: bf16[8,24], index: 3, kind: input, shape index: {}]   ;;  %s979_s4 = inlined_call_operand.vmem [shape: f32[8,1], index: 4, kind: input, shape index: {}]   ;;  %s980_s5 = inlined_call_operand.vmem [shape: bf16[8,4], index: 5, kind: input, shape index: {}]   ;;  %s981_s6 = inlined_call_operand.vmem [shape: f32[8,1], index: 6, kind: input, shape index: {}]   ;;  %s982_s7 = inlined_call_operand.hbm [shape: f32[2,8,256], index: 7, kind: output, shape index: {}]  }
   0x1   :  { %14 = vsyncpa [#allocation3 + $0x1], 0  ;;  %s813_s24 = smov 0   ;;  %s815_s25 = smov 0  }
   0x2   :  { %s817_s26 = smov 0   ;;  %s819_s27 = smov 0  }
   0x3   :  { %s821_s28 = smov 0   ;;  %s823_s29 = smov 0  }
   0x4   :  { %s825_s30 = smov 0   ;;  %s827_s8 = smov 0  }
   0x5 LB: > { %s576_s9 = sadd.s32 4294967295, %s767_s8   ;;  %s577_s10 = sadd.s32 4294967294, %s767_s8   ;;  %s767_s8 = sphi %s827_s8, %s20_s8   ;;  %s763_s30 = sphi %s825_s30, %s994_s30   ;;  %s759_s29 = sphi %s823_s29, %s993_s29   ;;  %s755_s28 = sphi %s821_s28, %s992_s28   ;;  %s751_s27 = sphi %s819_s27, %s991_s27   ;;  %s747_s26 = sphi %s817_s26, %s990_s26   ;;  %s743_s25 = sphi %s815_s25, %s989_s25   ;;  %s739_s24 = sphi %s813_s24, %s988_s24  }
   0x6   : > { %s29_s11 = sadd.s32 1, %s759_s29  ;;  %s32_s12 = sadd.s32 1, %s763_s30 }
   0x7   : > { %p30_p0 = scmp.ge.s32.totalorder %s29_s11, 2  ;;  %p203_p1 = scmp.ne.s32.totalorder %s747_s26, %s743_s25 }
   0x8   : > { %p204_p2 = scmp.eq.s32.totalorder %s576_s9, 3  ;;  %p209_p5 = scmp.ne.s32.totalorder %s743_s25, %s739_s24 }
   0x9   : > { %s996_s11 = smov (%p30_p0, %s29_s11), 0  ;;  %s998_s12 = smov (!%p30_p0, %s32_s12), %s763_s30 }
   0xa   : > { %s189_s13 = ssub.s32 %s759_s29, %s996_s11  ;;  %p864_p3 = por %p204_p2, %p203_p1 }
   0xb   : > { %p34_p4 = scmp.ge.s32.totalorder %s998_s12, 2  ;;  %p210_p6 = scmp.eq.s32.totalorder %s577_s10, 3 }
   0xc   : > { %p580_p7 = scmp.ge.s32.totalorder %s767_s8, 1  ;;  %p254_p9 = scmp.lt.s32.totalorder %s767_s8, 5 }
   0xd   : > { %s1000_s12 = smov (%p34_p4, %s998_s12), 0  ;;  %p873_p8 = por %p210_p6, %p209_p5 }
   0xe   : > { %985 = sst [smem:[#allocation5_spill]] %s1000_s12  ;;  %s188_s16 = ssub.s32 %s763_s30, %s1000_s12 }
   0xf   : > { %s193_s17 = sadd.s32 1, %s747_s26  ;;  %s190_s18 = sor.u32 %s189_s13, %s188_s16 }
  0x10   : > { %p255_p10 = pnand %p580_p7, %p254_p9  ;;  %p191_p11 = scmp.eq.s32.totalorder %s190_s18, 0 }
  0x11   : > { %p286_p12 = scmp.lt.s32.totalorder (!%p255_p10), %s755_s28, 1  ;;  %s583_s20 = sshll.u32 (!%p255_p10), %s751_s27, 7 }
  0x12   : > { %s882_s19 = scalar_select %p191_p11, %s747_s26, %s193_s17  }
  0x13   : > { %258 = sbr.rel (%p255_p10) target bundleno = 591 (0x24f), region = 48  ;;  %s293_s21 = sshra.s32 (!%p255_p10), %s583_s20, 7 }
  0x14   : > { %s584_s9 = sshll.u32 (!%p255_p10), %s293_s21, 1  ;;  %s769_s17 = smov (!%p255_p10), 127  }
  0x15   : > { %s770_s18 = smov (!%p255_p10), 126  }
  0x18   : > { %s287_s22 = scalar_select %p286_p12, %s755_s28, 1  ;;  %v337_v7 = vld [vmem:[%s977_s2] sm:$0xff]  ;;  %v771_v8 = vmov 0   ;;  %vm312_vm0 = vcmask 1039360   ;;  %vm326_vm1 = vcmask 1041408   ;;  %vm324_vm2 = vcmask 1031168  }
  0x19   : > { %671 = vset.pattern.permute.xlu2 %v771_v8  ;;  %672 = vset.pattern.permute.xlu0 %v771_v8  ;;  %vm331_vm3 = vcmask 1043456   ;;  %vm347_vm4 = vcmask 1045504   ;;  %v336_v21 = vld [vmem:[%s976_s1] sm:$0xf]  ;;  %vm343_vm5 = vcmask 97280   ;;  %v381_v22 = vlaneseq }
  0x1a   : > { %s595_s23 = smul.u32 6, %s287_s22  ;;  %340 = vperm.xlu2 %671, %v337_v7   ;;  %v416_v46 = vld [vmem:[%s979_s4] sm:$0xff]  ;;  %vm459_vm8 = vcmask 1014784   ;;  %vm422_vm9 = vcmask 195584   ;;  %vm461_vm10 = vcmask 31744  }
  0x1b   : > { %v382_v23 = vand.u32 127, %v381_v22  ;;  %v444_v47 = vld [vmem:[%s981_s6] sm:$0xff] }
  0x1c   : > { %s290_s13 = scalar_lea.vmem %s975_s0, %s595_s23  ;;  %v415_v56 = vld [vmem:[%s978_s3] sm:$0xf]  ;;  %s591_s23 = sshll.u32 %s755_s28, 1 }
  0x1d   : > { %s296_s16 = scalar_lea.vmem %s290_s13, %s584_s9  ;;  %s587_s9 = sadd.s32 4294967294, %s583_s20  ;;  %v383_v24 = vadd.s32 128, %v382_v23  ;;  %v443_v61 = vld [vmem:[%s980_s5] sm:$0xf] }
  0x1e   : > { %v297_v0 = vld [vmem:[%s296_s16] sm:$0xf]  ;;  %v384_v25 = vstv %s587_s9  ;;  %s772_s20 = smov 124   ;;  %s283_s9 = sand.u32 1, %s743_s25  }
  0x1f   : > { %299 = vst [vmem:[#allocation1] ss:$4 sm:$0xff] %v297_v0  ;;  %v386_v27 = vadd.s32 %v384_v25, %v383_v24  ;;  %v385_v28 = vadd.s32 %v384_v25, %v382_v23  ;;  %s581_s10 = sshll.u32 %s283_s9, 3 }
  0x21   : > { %vm388_vm6 = vcmp.ge.s32.totalorder %v386_v27, 0  ;;  %vm387_vm7 = vcmp.ge.s32.totalorder %v385_v28, 0 }
  0x26   : > { %v300_v1 = vld.sshfl [vmem:[#allocation1] sm:$0xff pattern:$0x73625140]  ;;  %v301_v2 = vld.sshfl [vmem:[#allocation1 + $0x8] sm:$0xff pattern:$0x73625140] }
  0x27   : > { %303 = vst [vmem:[#allocation1 + $0x1] ss:$4 sm:$0xff] %v297_v0 }
  0x2e   : > { %v304_v3 = vld.sshfl [vmem:[#allocation1] sm:$0xff pattern:$0x73625140]  ;;  %v306_v4 = vld.sshfl [vmem:[#allocation1 + $0x8] sm:$0xff pattern:$0x73625140] }
  0x2f   : > { %308 = vrot.lane.b32.xlu0 %v304_v3, %s769_s17  ;;  %315 = vst [vmem:[#allocation1 + $0x2] ss:$4 sm:$0xff] %v297_v0 }
  0x36   : > { %v316_v5 = vld.sshfl [vmem:[#allocation1] sm:$0xff pattern:$0x73625140]  ;;  %v318_v6 = vld.sshfl [vmem:[#allocation1 + $0x8] sm:$0xff pattern:$0x73625140] }
  0x37   : > { %310 = vrot.lane.b32.xlu0 %v306_v4, %s769_s17  ;;  %320 = vrot.lane.b32.xlu1 %v316_v5, %s770_s18  ;;  %450 = vst [vmem:[#allocation1] ss:$4 sm:$0xff] %v297_v0 }
  0x3e   : > { %v453_v44 = vld.sshfl [vmem:[#allocation1 + $0x8] sm:$0xff pattern:$0x73625140]  ;;  %v451_v45 = vld.sshfl [vmem:[#allocation1] sm:$0xff pattern:$0x73625140] }
  0x3f   : > { %322 = vrot.lane.b32.xlu1 %v318_v6, %s770_s18 }
  0x74   : > { %v341_v26 = vpop.permute.xlu2 %340 }
  0xa1   : > { %v309_v9 = vpop.permute.xlu0 %308 }
  0xa9   : > { %v321_v10 = vpop.permute.xlu1 %320  ;;  %v311_v11 = vpop.permute.xlu0 %310 }
  0xaa   : > { %v313_v12 = vsel %vm312_vm0, %v309_v9, %v311_v11  ;;  %v330_v13 = vsel %vm326_vm1, %v301_v2, %v311_v11 }
  0xab   : > { %v328_v17 = vsel %vm326_vm1, %v300_v1, %v313_v12 }
  0xb1   : > { %v323_v14 = vpop.permute.xlu1 %322 }
  0xb2   : > { %v325_v15 = vsel %vm324_vm2, %v321_v10, %v323_v14  ;;  %v335_v16 = vsel %vm331_vm3, %v330_v13, %v323_v14 }
  0xb3   : > { %v350_v18 = vsel %vm347_vm4, %v335_v16, 0  ;;  %v333_v19 = vsel %vm331_vm3, %v328_v17, %v325_v15 }
  0xb4   : > { %372 = vmatpush.bf16.msra.mxu1 %v350_v18  ;;  %v348_v20 = vsel %vm347_vm4, %v333_v19, 0 }
  0xb5   : > { %359 = vmatpush.bf16.msra.mxu0 %v348_v20 }
  0xb7   : > { %586 = vmatmul.msk.bf16.vlgmr.msra.gmra.mxu1 %vm343_vm5, %v336_v21 }
  0xb8   : > { %585 = vmatmul.msk.bf16.vlgmr.msra.gmra.mxu0 %vm343_vm5, %v336_v21 }
 0x134   : > { %v374_v29 = vpop.f32.mrf.mxu1 }
 0x135   : > { %v375_v30 = vadd.f32 %v374_v29, %v341_v26  ;;  %v361_v31 = vpop.f32.mrf.mxu0 }
 0x136   : > { %v362_v32 = vadd.f32 %v361_v31, %v341_v26 }
 0x137   : > { %v379_v33 = vmax.f32 %v375_v30, 0.0 }
 0x138   : > { %v378_v34 = vmax.f32 %v362_v32, 0.0 }
 0x139   : > { %v394_v35 = vsel %vm388_vm6, %v379_v33, 0.0 }
 0x13a   : > { %v393_v36 = vsel %vm387_vm7, %v378_v34, 0.0 }
 0x13b   : > { %v395_v37 = vpack.c.bf16 %v394_v35, %v393_v36 }
 0x13c   : > { %v376_v38 = vpop.f32.mrf.mxu1 }
 0x13d   : > { %v363_v39 = vpop.f32.mrf.mxu0  ;;  %v398_v40 = vunpack.c.h.b16 %v395_v37  ;;  %v397_v41 = vunpack.c.l.b16 %v395_v37 }
 0x13f   : > { %v400_v42 = vpack.c.b16 %v398_v40, %v398_v40  ;;  %v399_v43 = vpack.c.b16 %v397_v41, %v397_v41 }
 0x141   : > { %408 = vrot.lane.b32.xlu0 %v400_v42, %s770_s18  ;;  %401 = vrot.lane.b32.xlu1 %v399_v43, %s769_s17 }
 0x142   : > { %406 = vrot.lane.b32.xlu2 %v399_v43, %s770_s18  ;;  %s285_s18 = scalar_lea.vmem [#allocation2], %s581_s10  ;;  %s693_s10 = scalar_lea.hbm %s982_s7, 32 }
 0x143   : > { %s499_s21 = sshll.u32 %s285_s18, 4  ;;  %s500_s21 = int_to_ptr.vmem [resolvable:$true] %s499_s21 }
 0x149   : > { %457 = vrot.lane.b32.xlu1 %v453_v44, %s772_s20  ;;  %455 = vrot.lane.b32.xlu0 %v451_v45, %s772_s20  ;;  %s495_s20 = sadd.s32 %s751_s27, %s591_s23  ;;  %s485_s27 = scalar_lea.sflag [#allocation3], %s283_s9 }
 0x14a   : > { %403 = vrot.lane.b32.xlu2 %v400_v42, %s769_s17  ;;  %s592_s13 = sshll.u32 %s495_s20, 3 }
 0x14b   : > { %s497_s17 = scalar_lea.hbm %s982_s7, %s592_s13 }
 0x14c   : > { %s501_s22 = sshll.u32 %s497_s17, 4  ;;  %s502_s22 = int_to_ptr.hbm [resolvable:$true] %s501_s22 }
 0x14d   : > { %s687_s28 = sshra.s32 %s502_s22, 4  ;;  %s688_s28 = int_to_ptr.hbm [resolvable:$true] %s687_s28 }
 0x14e   : > { %s689_s23 = scalar_lea.hbm %s688_s28, 8  ;;  %p694_p2 = scmp.lt.s32.totalorder %s688_s28, %s982_s7 }
 0x14f   : > { %p690_p13 = scmp.ne.s32.totalorder %s688_s28, %s689_s23  ;;  %p695_p4 = scmp.lt.s32.totalorder %s693_s10, %s689_s23 }
 0x151   : > { %447 = vperm.xlu0 %672, %v444_v47   ;;  %p691_p0 = pnand %p690_p13, %p864_p3  ;;  %p696_p5 = por %p695_p4, %p694_p2 }
 0x152   : > { %419 = vperm.xlu2 %671, %v416_v46  }
 0x153   : > { %p692_p1 = pneg %p691_p0 }
 0x155   : > { %p697_p6 = pnand %p696_p5, %p692_p1 }
 0x19c   : > { %v407_v48 = vpop.permute.xlu2 %406 }
 0x1a4   : > { %v404_v52 = vpop.permute.xlu2 %403 }
 0x1ac   : > { %v420_v62 = vpop.permute.xlu2 %419 }
 0x1b3   : > { %v409_v49 = vpop.permute.xlu0 %408  ;;  %v402_v50 = vpop.permute.xlu1 %401 }
 0x1b4   : > { %v410_v51 = vsel %vm324_vm2, %v407_v48, %v409_v49  ;;  %v405_v54 = vsel %vm312_vm0, %v402_v50, %v404_v52 }
 0x1b5   : > { %v427_v53 = vsel %vm331_vm3, %v410_v51, 0  ;;  %v413_v55 = vsel %vm331_vm3, %v395_v37, %v405_v54 }
 0x1b6   : > { %435 = vmatpush.bf16.msra.mxu2 %v427_v53 }
 0x1ba   : > { %436 = vmatpush.bf16.msra.mxu2 %v413_v55 }
 0x1bb   : > { %v458_v57 = vpop.permute.xlu1 %457  ;;  %v456_v58 = vpop.permute.xlu0 %455 }
 0x1bc   : > { %v460_v59 = vsel %vm459_vm8, %v456_v58, %v458_v57 }
 0x1bd   : > { %588 = vmatmul.msk.bf16.vlgmr.msra.gmra.mxu2 %vm422_vm9, %v415_v56  ;;  %v466_v60 = vsel %vm326_vm1, %v460_v59, 0 }
 0x1be   : > { %475 = vmatpush.bf16.msra.mxu3 %v466_v60 }
 0x1c1   : > { %589 = vmatmul.msk.bf16.vlgmr.msra.gmra.mxu3 %vm461_vm10, %v443_v61 }
 0x1c3   : > { %v448_v1 = vpop.permute.xlu0 %447 }
 0x240   : > { %v438_v63 = vpop.f32.mrf.mxu2 }
 0x241   : > { %v439_v0 = vadd.f32 %v438_v63, %v420_v62 }
 0x243   : > { %v442_v3 = vmax.f32 %v439_v0, 0.0 }
 0x244   : > { %v477_v2 = vpop.f32.mrf.mxu3 }
 0x245   : > { %v478_v4 = vadd.f32 %v477_v2, %v448_v1 }
 0x247   : > { %v481_v5 = vadd.f32 %v478_v4, %v442_v3 }
 0x248   : > { %v440_v6 = vpop.f32.mrf.mxu2 }
 0x249   : > { %v482_v7 = vmax.f32 %v481_v5, 0.0 }
 0x24b   : > { %483 = vst [vmem:[%s285_s18] sm:$0xff] %v482_v7 }
 0x24c   : > { %v479_v8 = vpop.f32.mrf.mxu3 }
 0x24d   : > { %700 = shalt.err (!%p697_p6)
}
 0x24e   : > { %596 = dma.vmem_to_hbm [thread:$0]  (%p864_p3), %s500_s21, 128, %s502_s22, %s485_s27  }
 0x24f PF: > { %p602_p7 = scmp.ge.s32.totalorder %s767_s8, 2  ;;  %s513_s9 = sand.u32 1, %s739_s24  }
 0x250   : > { %s514_s17 = scalar_lea.sflag [#allocation3], %s513_s9 }
 0x251   : > { %p599_p9 = pnand %p602_p7, %p873_p8 }
 0x253   : > { %p600_p10 = pneg %p599_p9 }
 0x255   : > { %734 = dma.done.wait (%p600_p10), %s514_s17, 128  }
 0x256   : > { %736 = vsyncadd (%p600_p10), %s514_s17, 4294967168  ;;  %s20_s8 = sadd.s32 1, %s767_s8   ;;  %s987_s14 = sld [smem:[#allocation5_spill]] }
 0x257   : > { %p17_p11 = scmp.ge.s32.totalorder %s20_s8, 6   ;;  %s988_s24 = smov %s743_s25 }
 0x258   : > { %s989_s25 = smov %s747_s26  ;;  %s990_s26 = smov %s882_s19 }
 0x259   : > { %s991_s27 = smov %s759_s29  ;;  %s992_s28 = smov %s763_s30 }
 0x25a   : > { %s993_s29 = smov %s996_s11  ;;  %19 = sbr.rel (!%p17_p11) target bundleno = 5 (0x5), region = 86 }
 0x25c   : > { %s994_s30 = smov %s987_s14 }
 0x25f   :  { %520 = vsyncpa [#allocation3], 1 }
 0x260   :  { %522 = vsyncpa [#allocation3 + $0x1], 1 }

</bundles_post_ra>
